<compile_context>
chip_gen: v6e
topology: v6e:2x2x1
jax: 0.10.0
libtpu: 0.0.40
codegen_flags: <defaults>
</compile_context>

<pallas_src>
import math

import jax
import jax.numpy as jnp
from jax.experimental import pallas as pl
from jax.experimental.pallas import tpu as pltpu


# Scoped-VMEM ceiling for both kernels.  Tiles below keep the double-buffered working
# set to a few MiB, well inside v5e (16 MiB default scoped), v6e (32 MiB default) and
# v7x (64 MiB physical); raising the limit explicitly keeps the large tiles on v5e.
_VMEM_LIMIT_BYTES = 48 * 1024 * 1024


def _pick_tile(dim, pref):
    """Largest convenient tile: `pref` when it divides `dim`, else the full dim."""
    return pref if dim % pref == 0 else dim


# ----------------------------------------------------------------------------
# Kernel 1: tiled linear projection  y = x @ Wt + b   (Wt is (Din, Dout))
# ----------------------------------------------------------------------------
def linear_kernel(x_ref, wt_ref, b_ref, o_ref, acc_ref):
    k = pl.program_id(2)

    @pl.when(k == 0)
    def _():
        acc_ref[...] = jnp.zeros_like(acc_ref)

    x = x_ref[...].astype(jnp.bfloat16)      # (tm, tk)
    w = wt_ref[...].astype(jnp.bfloat16)     # (tk, tn) -- no in-kernel transpose
    acc_ref[...] += jnp.dot(x, w, preferred_element_type=jnp.float32)

    @pl.when(k == pl.num_programs(2) - 1)
    def _():
        y = acc_ref[...] + b_ref[...].astype(jnp.float32)
        o_ref[...] = y.astype(o_ref.dtype)


def pallas_linear(x, wt, b, *, tm=256, tn=256, tk=512, out_dtype=jnp.bfloat16):
    """x: (M, K), wt: (K, N) pre-transposed, b: (N,). Returns (M, N) in `out_dtype`."""
    M, K = x.shape
    K2, N = wt.shape
    assert K == K2
    tm, tn, tk = _pick_tile(M, tm), _pick_tile(N, tn), _pick_tile(K, tk)
    grid = (M // tm, N // tn, K // tk)
    return pl.pallas_call(
        linear_kernel,
        out_shape=jax.ShapeDtypeStruct((M, N), out_dtype),
        grid_spec=pltpu.PrefetchScalarGridSpec(
            num_scalar_prefetch=0,
            grid=grid,
            in_specs=[
                pl.BlockSpec((tm, tk), lambda i, j, k: (i, k)),
                pl.BlockSpec((tk, tn), lambda i, j, k: (k, j)),
                pl.BlockSpec((1, tn), lambda i, j, k: (0, j)),
            ],
            out_specs=pl.BlockSpec((tm, tn), lambda i, j, k: (i, j)),
            scratch_shapes=[pltpu.VMEM((tm, tn), jnp.float32)],
        ),
        compiler_params=pltpu.CompilerParams(
            dimension_semantics=("parallel", "parallel", "arbitrary"),
            vmem_limit_bytes=_VMEM_LIMIT_BYTES,
        ),
    )(x, wt, b.reshape(1, N))


# ----------------------------------------------------------------------------
# Kernel 2: attention — one batch element per grid step, all heads batched
# ----------------------------------------------------------------------------
def make_attention_kernel(head_dim):
    inv_scale = 1.0 / math.sqrt(head_dim)

    def attention_kernel(q_ref, k_ref, v_ref, mask_ref, tmask_ref,
                         ctx_ref, probs_ref):
        # Blocks:
        #   q: (1, H, Sq, Dh)   k, v: (1, H, Sk, Dh)       (bf16)
        #   mask : (1, Sq_or_1, Sk) additive, head-uniform (f32)
        #   tmask: (1, Sq, 1)   multiplicative, post-softmax (f32)
        # Scale Q (small Sq x Dh tile) instead of the Sq x Sk scores.
        q = (q_ref[0].astype(jnp.float32) * inv_scale).astype(jnp.bfloat16)
        k = k_ref[0].astype(jnp.bfloat16)
        v = v_ref[0].astype(jnp.bfloat16)
        mask = mask_ref[...].astype(jnp.float32)    # broadcasts over (H, Sq)
        tmask = tmask_ref[...].astype(jnp.float32)  # broadcasts over (H, Sk)

        # (H, Sq, Sk) — single batched dot_general (leading batch dim, no transposes).
        scores = jnp.einsum("hqd,hkd->hqk", q, k,
                            preferred_element_type=jnp.float32)
        scores = scores + mask

        # Numerically stable softmax; reciprocal on the EUP (free VLIW slot).
        scores = scores - jnp.max(scores, axis=-1, keepdims=True)
        e = jnp.exp(scores)
        denom = jnp.sum(e, axis=-1, keepdims=True)
        probs = e * pl.reciprocal(denom, approx=True)

        # attention_probs * tmp_att_mask.unsqueeze(1).unsqueeze(3)  (torch semantics)
        probs = probs * tmask

        ctx = jnp.einsum("hqk,hkd->hqd", probs.astype(jnp.bfloat16), v,
                         preferred_element_type=jnp.float32)

        ctx_ref[0] = ctx.astype(ctx_ref.dtype)
        probs_ref[0] = probs.astype(probs_ref.dtype)

    return attention_kernel


def pallas_attention(q, k, v, attn_mask, tmp_mask):
    """q,k,v: (B,H,S,Dh) bf16; attn_mask: (B, Sq_or_1, Sk) f32; tmp_mask: (B,Sq,1) f32."""
    B, H, Sq, Dh = q.shape
    Sk = k.shape[2]
    Sqm = attn_mask.shape[1]

    kernel = make_attention_kernel(Dh)
    ctx, probs = pl.pallas_call(
        kernel,
        out_shape=(
            jax.ShapeDtypeStruct((B, H, Sq, Dh), jnp.float32),
            jax.ShapeDtypeStruct((B, H, Sq, Sk), jnp.float32),
        ),
        grid=(B,),
        in_specs=[
            pl.BlockSpec((1, H, Sq, Dh), lambda b: (b, 0, 0, 0)),
            pl.BlockSpec((1, H, Sk, Dh), lambda b: (b, 0, 0, 0)),
            pl.BlockSpec((1, H, Sk, Dh), lambda b: (b, 0, 0, 0)),
            pl.BlockSpec((1, Sqm, Sk), lambda b: (b, 0, 0)),
            pl.BlockSpec((1, Sq, 1), lambda b: (b, 0, 0)),
        ],
        out_specs=(
            pl.BlockSpec((1, H, Sq, Dh), lambda b: (b, 0, 0, 0)),
            pl.BlockSpec((1, H, Sq, Sk), lambda b: (b, 0, 0, 0)),
        ),
        compiler_params=pltpu.CompilerParams(
            dimension_semantics=("parallel",),   # batch shards across v7x's 2 TCs
            vmem_limit_bytes=_VMEM_LIMIT_BYTES,
        ),
    )(q, k, v, attn_mask, tmp_mask)
    return ctx, probs


# ----------------------------------------------------------------------------
# BertAttention forward (parameters + glue in plain JAX)
# ----------------------------------------------------------------------------
class BertAttentionPallas:
    def __init__(self, hidden_size, num_heads, ctx_dim=None, key=None):
        if hidden_size % num_heads != 0:
            raise ValueError("hidden size not a multiple of num heads")
        self.hidden_size = hidden_size
        self.num_heads = num_heads
        self.head_dim = hidden_size // num_heads
        self.all_head_size = num_heads * self.head_dim
        if ctx_dim is None:
            ctx_dim = hidden_size

        key = jax.random.PRNGKey(0) if key is None else key
        ks = jax.random.split(key, 6)

        def lin_init(kw, kb, out_f, in_f):
            bound = 1.0 / math.sqrt(in_f)
            w = jax.random.uniform(kw, (out_f, in_f), jnp.float32, -bound, bound)
            b = jax.random.uniform(kb, (out_f,), jnp.float32, -bound, bound)
            return w, b

        # f32 master weights in torch (out, in) layout (used by the reference).
        self.q_w, self.q_b = lin_init(ks[0], ks[1], self.all_head_size, hidden_size)
        self.k_w, self.k_b = lin_init(ks[2], ks[3], self.all_head_size, ctx_dim)
        self.v_w, self.v_b = lin_init(ks[4], ks[5], self.all_head_size, ctx_dim)

        # Kernel copies: pre-transposed to (in, out), cast to bf16, K|V fused.
        self.q_wt = jnp.asarray(self.q_w.T, jnp.bfloat16)
        self.kv_wt = jnp.asarray(
            jnp.concatenate([self.k_w, self.v_w], axis=0).T, jnp.bfloat16)
        self.kv_b = jnp.concatenate([self.k_b, self.v_b], axis=0)

    def __call__(self, hidden_states, context, attention_mask=None,
                 tmp_att_mask=None):
        B, Sq, _ = hidden_states.shape
        Sk = context.shape[1]
        H, Dh, A = self.num_heads, self.head_dim, self.all_head_size

        # Q and fused K|V projections (bf16 activations halve HBM traffic).
        xq = hidden_states.reshape(B * Sq, -1).astype(jnp.bfloat16)
        xc = context.reshape(B * Sk, -1).astype(jnp.bfloat16)
        q = pallas_linear(xq, self.q_wt, self.q_b)       # (B*Sq, A)   bf16
        kv = pallas_linear(xc, self.kv_wt, self.kv_b)    # (B*Sk, 2A)  bf16
        k, v = kv[:, :A], kv[:, A:]

        # (B, S, A) -> (B, H, S, Dh).
        # TODO(synk): this head-split transpose (and its inverse on ctx below) stays in
        # XLA; slicing Dh(<128)-wide lane blocks via BlockSpec would force lane-sparse
        # masked stores, so the cheap fused XLA transpose wins.
        q = jnp.transpose(q.reshape(B, Sq, H, Dh), (0, 2, 1, 3))
        k = jnp.transpose(k.reshape(B, Sk, H, Dh), (0, 2, 1, 3))
        v = jnp.transpose(v.reshape(B, Sk, H, Dh), (0, 2, 1, 3))

        # Compact, head-uniform mask inputs (no Sq-times broadcast in HBM).
        if attention_mask is None:
            attn_mask = jnp.zeros((B, 1, Sk), jnp.float32)
        else:
            am = attention_mask.astype(jnp.float32)
            if am.ndim == 4:            # (B, 1, Sq_or_1, Sk), head-uniform (BlendNetT)
                am = am[:, 0]
            elif am.ndim == 2:          # (B, Sk)
                am = am[:, None, :]
            attn_mask = jnp.broadcast_to(am, (B, am.shape[1], Sk))
        if tmp_att_mask is None:
            tmp_mask = jnp.ones((B, Sq, 1), jnp.float32)
        else:
            tmp_mask = tmp_att_mask.astype(jnp.float32).reshape(B, Sq, 1)

        ctx, probs = pallas_attention(q, k, v, attn_mask, tmp_mask)

        # (B, H, Sq, Dh) -> (B, Sq, H*Dh)
        ctx = jnp.transpose(ctx, (0, 2, 1, 3)).reshape(B, Sq, A)
        return ctx, probs


# ----------------------------------------------------------------------------
# Pure-JAX (no Pallas) reference.  Mirrors the kernel's mixed precision
# (bf16 MXU operands, f32 accumulation) so the comparison isolates kernel bugs
# from expected bf16 rounding.
# ----------------------------------------------------------------------------
def reference_forward(mod, hidden_states, context, attention_mask, tmp_att_mask):
    bf = jnp.bfloat16
    B, Sq, _ = hidden_states.shape
    Sk = context.shape[1]
    H, Dh, A = mod.num_heads, mod.head_dim, mod.all_head_size

    def lin(x, w, b):
        y = jnp.dot(x.astype(bf), w.T.astype(bf),
                    preferred_element_type=jnp.float32) + b
        return y.astype(bf)

    q = lin(hidden_states.reshape(B * Sq, -1), mod.q_w, mod.q_b)
    k = lin(context.reshape(B * Sk, -1), mod.k_w, mod.k_b)
    v = lin(context.reshape(B * Sk, -1), mod.v_w, mod.v_b)
    q = jnp.transpose(q.reshape(B, Sq, H, Dh), (0, 2, 1, 3))
    k = jnp.transpose(k.reshape(B, Sk, H, Dh), (0, 2, 1, 3))
    v = jnp.transpose(v.reshape(B, Sk, H, Dh), (0, 2, 1, 3))

    qs = (q.astype(jnp.float32) / math.sqrt(Dh)).astype(bf)
    scores = jnp.einsum("bhqd,bhkd->bhqk", qs, k,
                        preferred_element_type=jnp.float32)
    if attention_mask is not None:
        scores = scores + attention_mask.astype(jnp.float32)
    probs = jax.nn.softmax(scores, axis=-1)
    if tmp_att_mask is not None:
        probs = probs * tmp_att_mask.astype(jnp.float32)[:, None, :, None]
    ctx = jnp.einsum("bhqk,bhkd->bhqd", probs.astype(bf), v,
                     preferred_element_type=jnp.float32)
    ctx = jnp.transpose(ctx, (0, 2, 1, 3)).reshape(B, Sq, A)
    return ctx, probs


if __name__ == "__main__":
    # Small config consistent with the module: hidden_size=32, heads=4 -> head_dim=8.
    B, Sq, Sk, HIDDEN, HEADS = 2, 8, 8, 32, 4

    key = jax.random.PRNGKey(0)
    k_h, k_c, k_m, k_t, k_p = jax.random.split(key, 5)

    hidden_states = jax.random.normal(k_h, (B, Sq, HIDDEN), jnp.float32)
    context = jax.random.normal(k_c, (B, Sk, HIDDEN), jnp.float32)
    # BlendNetT-style additive mask (B, 1, 1, Sk) of {0, -10000}.
    attention_mask = jnp.where(
        jax.random.uniform(k_m, (B, 1, 1, Sk)) > 0.2, 0.0, -10000.0
    ).astype(jnp.float32)
    # Multiplicative mask over query positions (B, Sq).
    tmp_att_mask = (jax.random.uniform(k_t, (B, Sq)) > 0.1).astype(jnp.float32)

    mod = BertAttentionPallas(HIDDEN, HEADS, key=k_p)

    ctx_out, probs_out = mod(hidden_states, context, attention_mask, tmp_att_mask)
    ctx_out = jax.block_until_ready(ctx_out)
    probs_out = jax.block_until_ready(probs_out)

    ctx_ref, probs_ref = reference_forward(
        mod, hidden_states, context, attention_mask, tmp_att_mask)

    assert ctx_out.shape == (B, Sq, HIDDEN)
    assert probs_out.shape == (B, HEADS, Sq, Sk)
    assert jnp.allclose(ctx_out, ctx_ref, atol=2e-2, rtol=2e-2), (
        "ctx max abs diff = %f" % float(jnp.max(jnp.abs(ctx_out - ctx_ref))))
    assert jnp.allclose(probs_out, probs_ref, atol=2e-2, rtol=2e-2), (
        "probs max abs diff = %f" % float(jnp.max(jnp.abs(probs_out - probs_ref))))

    print("KERNEL_OK")
</pallas_src>

<mosaic_0001>
module attributes {stable_mosaic.version = 11 : i64} {
  func.func @linear_kernel(%arg0: i32, %arg1: i32, %arg2: i32, %arg3: memref<16x32xbf16, #tpu.memory_space<vmem>>, %arg4: memref<32x32xbf16, #tpu.memory_space<vmem>>, %arg5: memref<1x32xf32, #tpu.memory_space<vmem>>, %arg6: memref<16x32xbf16, #tpu.memory_space<vmem>>, %arg7: memref<16x32xf32, #tpu.memory_space<vmem>>) attributes {dimension_semantics = [#tpu.dimension_semantics<parallel>, #tpu.dimension_semantics<parallel>, #tpu.dimension_semantics<arbitrary>], iteration_bounds = array<i64: 1, 1, 1>, scalar_prefetch = 0 : i64, scratch_operands = 1 : i64, tpu.core_type = #tpu.core_type<tc>, window_params = [{transform_indices = @transform_0, window_bounds = array<i64: 16, 32>}, {transform_indices = @transform_1, window_bounds = array<i64: 32, 32>}, {transform_indices = @transform_2, window_bounds = array<i64: 1, 32>}, {transform_indices = @transform_3, window_bounds = array<i64: 16, 32>}]} {
    %c0_i32 = arith.constant 0 : i32
    %0 = arith.cmpi eq, %arg2, %c0_i32 : i32
    %1 = arith.extui %0 : i1 to i32
    %c0_i32_0 = arith.constant 0 : i32
    %2 = arith.cmpi ne, %1, %c0_i32_0 : i32
    scf.if %2 {
      %cst_10 = arith.constant 0.000000e+00 : f32
      %12 = vector.broadcast %cst_10 : f32 to vector<16x32xf32>
      %c0_11 = arith.constant 0 : index
      %c0_12 = arith.constant 0 : index
      %13 = vector.load %arg7[%c0_11, %c0_12] : memref<16x32xf32, #tpu.memory_space<vmem>>, vector<16x32xf32>
      tpu.vector_store %arg7[%c0_11, %c0_12], %12 {strides = array<i32>} : memref<16x32xf32, #tpu.memory_space<vmem>>, vector<16x32xf32>,
    } else {
    }
    %c0 = arith.constant 0 : index
    %c0_1 = arith.constant 0 : index
    %3 = vector.load %arg3[%c0, %c0_1] : memref<16x32xbf16, #tpu.memory_space<vmem>>, vector<16x32xbf16>
    %c0_2 = arith.constant 0 : index
    %c0_3 = arith.constant 0 : index
    %4 = vector.load %arg4[%c0_2, %c0_3] : memref<32x32xbf16, #tpu.memory_space<vmem>>, vector<32x32xbf16>
    %c0_4 = arith.constant 0 : index
    %c0_5 = arith.constant 0 : index
    %5 = vector.load %arg7[%c0_4, %c0_5] : memref<16x32xf32, #tpu.memory_space<vmem>>, vector<16x32xf32>
    %cst = arith.constant dense<0.000000e+00> : vector<16x32xf32>
    %6 = tpu.matmul %3, %4, %cst {dimension_numbers = #tpu.dot_dimension_numbers<[1], [0], [0], [1], [0, 0, 1, 1], [], []>} : vector<16x32xbf16>, vector<32x32xbf16>, vector<16x32xf32> -> vector<16x32xf32>
    %7 = arith.addf %5, %6 : vector<16x32xf32>
    %c0_6 = arith.constant 0 : index
    %c0_7 = arith.constant 0 : index
    %8 = vector.load %arg7[%c0_6, %c0_7] : memref<16x32xf32, #tpu.memory_space<vmem>>, vector<16x32xf32>
    tpu.vector_store %arg7[%c0_6, %c0_7], %7 {strides = array<i32>} : memref<16x32xf32, #tpu.memory_space<vmem>>, vector<16x32xf32>,
    %c0_i32_8 = arith.constant 0 : i32
    %9 = arith.cmpi eq, %arg2, %c0_i32_8 : i32
    %10 = arith.extui %9 : i1 to i32
    %c0_i32_9 = arith.constant 0 : i32
    %11 = arith.cmpi ne, %10, %c0_i32_9 : i32
    scf.if %11 {
      %c0_10 = arith.constant 0 : index
      %c0_11 = arith.constant 0 : index
      %12 = vector.load %arg7[%c0_10, %c0_11] : memref<16x32xf32, #tpu.memory_space<vmem>>, vector<16x32xf32>
      %c0_12 = arith.constant 0 : index
      %c0_13 = arith.constant 0 : index
      %13 = vector.load %arg5[%c0_12, %c0_13] : memref<1x32xf32, #tpu.memory_space<vmem>>, vector<1x32xf32>
      %14 = vector.broadcast %13 : vector<1x32xf32> to vector<16x32xf32>
      %15 = arith.addf %12, %14 : vector<16x32xf32>
      %16 = arith.truncf %15 : vector<16x32xf32> to vector<16x32xbf16>
      %c0_14 = arith.constant 0 : index
      %c0_15 = arith.constant 0 : index
      %17 = vector.load %arg6[%c0_14, %c0_15] : memref<16x32xbf16, #tpu.memory_space<vmem>>, vector<16x32xbf16>
      tpu.vector_store %arg6[%c0_14, %c0_15], %16 {strides = array<i32>} : memref<16x32xbf16, #tpu.memory_space<vmem>>, vector<16x32xbf16>,
    } else {
    }
    return
  }
  func.func @transform_0(%arg0: i32, %arg1: i32, %arg2: i32) -> (i32, i32) {
    %c0_i32 = arith.constant 0 : i32
    return %arg0, %arg2 : i32, i32
  }
  func.func @transform_1(%arg0: i32, %arg1: i32, %arg2: i32) -> (i32, i32) {
    %c0_i32 = arith.constant 0 : i32
    return %arg2, %arg1 : i32, i32
  }
  func.func @transform_2(%arg0: i32, %arg1: i32, %arg2: i32) -> (i32, i32) {
    %c0_i32 = arith.constant 0 : i32
    %c0_i32_0 = arith.constant 0 : i32
    return %c0_i32, %arg1 : i32, i32
  }
  func.func @transform_3(%arg0: i32, %arg1: i32, %arg2: i32) -> (i32, i32) {
    %c0_i32 = arith.constant 0 : i32
    return %arg0, %arg1 : i32, i32
  }
}

</mosaic_0001>

<bundles_post_ra>
// kernel: tpu_custom_call.1
= control target key start
LH: loop header
LB: loop body
LE: loop exit
PB: predicated region body
PF: predicated region fallthrough
CT: control target
= control target key end

     0   :  { %8 = vsyncpa [#allocation4], 0  ;;  %s317_s0 = inlined_call_operand.hbm [shape: bf16[16,32], index: 0, kind: input, shape index: {}]   ;;  %s318_s1 = inlined_call_operand.hbm [shape: bf16[32,32], index: 1, kind: input, shape index: {}]   ;;  %s319_s2 = inlined_call_operand.vmem [shape: f32[1,32], index: 2, kind: input, shape index: {}]   ;;  %s320_s3 = inlined_call_operand.hbm [shape: bf16[16,32], index: 3, kind: output, shape index: {}]  }
   0x1   :  { %9 = vsyncpa [#allocation7], 0 }
   0x2   :  { %10 = vsyncpa [#allocation5], 0  ;;  %s264_s12 = smov [#allocation3]  }
   0x3   :  { %s16_s13 = sshll.u32 %s264_s12, 4  ;;  %s17_s13 = int_to_ptr.vmem [resolvable:$true] %s16_s13 }
   0x4   :  { %s206_s14 = scalar_lea.vmem %s17_s13, 128  ;;  %p211_p1 = scmp.lt.s32.totalorder %s17_s13, %s17_s13 }
   0x5   :  { %p207_p0 = scmp.ne.s32.totalorder %s17_s13, %s206_s14  ;;  %p212_p2 = scmp.lt.s32.totalorder %s206_s14, %s206_s14 }
   0x7   :  { %p213_p3 = por %p212_p2, %p211_p1 }
   0x9   :  { %p214_p4 = pnand %p213_p3, %p207_p0 }
   0xb   :  { %217 = shalt.err (!%p214_p4)
}
   0xc   :  { %s265_s15 = smov 64   ;;  %s266_s16 = smov 4  }
   0xd   :  { %22 = dma.hbm_to_vmem [thread:$0]  %s317_s0, 128, %s17_s13, [#allocation4], %s265_s15, %s265_s15, %s266_s16  }
   0xe   :  { %s267_s19 = smov [#allocation6]  }
   0xf   :  { %s28_s20 = sshll.u32 %s267_s19, 4  ;;  %s29_s20 = int_to_ptr.vmem [resolvable:$true] %s28_s20 }
  0x10   :  { %s226_s21 = scalar_lea.vmem %s29_s20, 256  ;;  %p231_p6 = scmp.lt.s32.totalorder %s29_s20, %s29_s20 }
  0x11   :  { %p227_p5 = scmp.ne.s32.totalorder %s29_s20, %s226_s21  ;;  %p232_p7 = scmp.lt.s32.totalorder %s226_s21, %s226_s21 }
  0x13   :  { %p233_p8 = por %p232_p7, %p231_p6 }
  0x15   :  { %p234_p9 = pnand %p233_p8, %p227_p5 }
  0x17   :  { %237 = shalt.err (!%p234_p9)
}
  0x18   :  { %34 = dma.hbm_to_vmem [thread:$0]  %s318_s1, 256, %s29_s20, [#allocation7], %s265_s15, %s265_s15, %s266_s16  }
  0x19   :  { %258 = dma.done.wait [#allocation4], 128  }
  0x1a   :  { %259 = vsyncadd [#allocation4], 4294967168 }
  0x1b   :  { %260 = dma.done.wait [#allocation7], 256  }
  0x1c   :  { %261 = vsyncadd [#allocation7], 4294967040  ;;  %vm48_vm0 = vcmask 261120   ;;  %v268_v0 = vmov 0.0   ;;  %vm269_vm1 = vmmov 0   ;;  %v195_v1 = vld [vmem:[#allocation6 + $0x8] sm:$0xff]  }
  0x1d   :  { %180 = vmatprep.subr.bf16.mxu0 %v268_v0  ;;  %184 = vmatprep.mubr.msk.bf16.mxu0 %vm269_vm1, %v268_v0  ;;  %49 = vst.msk [vmem:[#allocation2] sm:$0xff] %vm48_vm0, %v268_v0  ;;  %50 = vst.msk [vmem:[#allocation2 + $0x8] sm:$0xff] %vm48_vm0, %v268_v0  ;;  %v196_v2 = vld [vmem:[#allocation6] sm:$0xff]   ;;  %v197_v3 = vld [vmem:[#allocation3] sm:$0xff]   ;;  %vm147_vm2 = vcmask 257024   ;;  %s270_s24 = smov [#allocation8]  }
  0x1e   :  { %181 = vmatpush3.bf16.msra.mxu0 %v195_v1  ;;  %v172_v12 = vld [vmem:[%s319_s2] ss:$0 sm:$0xff]  ;;  %s155_s25 = sshll.u32 %s270_s24, 4  ;;  %s156_s25 = int_to_ptr.vmem [resolvable:$true] %s155_s25 }
  0x1f   :  { %182 = vmatprep.subr.bf16.mxu0 %v268_v0  ;;  %s238_s26 = scalar_lea.vmem %s156_s25, 128  ;;  %p243_p11 = scmp.lt.s32.totalorder %s156_s25, %s156_s25 }
  0x20   :  { %p239_p10 = scmp.ne.s32.totalorder %s156_s25, %s238_s26  ;;  %p244_p12 = scmp.lt.s32.totalorder %s238_s26, %s238_s26 }
  0x22   :  { %183 = vmatpush3.bf16.msra.mxu0 %v196_v2  ;;  %p245_p13 = por %p244_p12, %p243_p11 }
  0x24   :  { %v57_v4 = vld [vmem:[#allocation2] sm:$0xff]  ;;  %v58_v8 = vld [vmem:[#allocation2 + $0x8] sm:$0xff]  ;;  %p246_p0 = pnand %p245_p13, %p239_p10 }
  0x25   :  { %185 = vmatmul.mubr.msk.bf16.vlgmr.msra.gmra.mxu0 %vm48_vm0, %v197_v3 }
  0xe5   :  { %v114_v5 = vpop.f32.mrf.mxu0 }
  0xe6   :  { %v121_v6 = vadd.f32 %v114_v5, %v57_v4 }
  0xe7   :  { %v186_v7 = vpop.f32.mrf.mxu0 }
  0xe8   :  { %123 = vst.msk [vmem:[#allocation2] sm:$0xff] %vm48_vm0, %v121_v6 }
  0xe9   :  { %v117_v9 = vpop.f32.mrf.mxu0 }
  0xea   :  { %v122_v10 = vadd.f32 %v117_v9, %v58_v8 }
  0xeb   :  { %v187_v11 = vpop.f32.mrf.mxu0 }
  0xec   :  { %124 = vst.msk [vmem:[#allocation2 + $0x8] sm:$0xff] %vm48_vm0, %v122_v10 }
  0xef   :  { %v128_v13 = vld [vmem:[#allocation2] sm:$0xff] }
  0xf0   :  { %v137_v14 = vadd.f32 %v172_v12, %v128_v13 }
  0xf2   :  { %v175_v15 = vpack.c.bf16 %v137_v14, %v137_v14 }
  0xf3   :  { %v129_v16 = vld [vmem:[#allocation2 + $0x8] sm:$0xff] }
  0xf4   :  { %v138_v17 = vadd.f32 %v172_v12, %v129_v16  ;;  %148 = vst.msk [vmem:[#allocation8] sm:$0xf] %vm147_vm2, %v175_v15 }
  0xf6   :  { %v176_v18 = vpack.c.bf16 %v138_v17, %v138_v17 }
  0xf8   :  { %149 = vst.msk [vmem:[#allocation8 + $0x4] sm:$0xf] %vm147_vm2, %v176_v18 }
  0xf9   :  { %249 = shalt.err (!%p246_p0)
}
  0xfa   :  { %161 = dma.vmem_to_hbm [thread:$0]  %s156_s25, 128, %s320_s3, [#allocation5], %s265_s15, %s265_s15, %s266_s16  }
  0xfb   :  { %262 = dma.done.wait [#allocation5], 128  }
  0xfc   :  { %263 = vsyncadd [#allocation5], 4294967168 }
  0xfd   :  { %165 = vsyncpa [#allocation4], 1 }
  0xfe   :  { %166 = vsyncpa [#allocation7], 1 }
  0xff   :  { %167 = vsyncpa [#allocation5], 1 }

</bundles_post_ra>
